<compile_context>
chip_gen: v7x
topology: tpu7x:2x2x1
jax: 0.10.0
libtpu: 0.0.40
codegen_flags: <defaults>
</compile_context>

<pallas_src>
import functools

import jax
import jax.numpy as jnp
from jax.experimental import pallas as pl
from jax.experimental.pallas import tpu as pltpu


def _round_up(x: int, m: int) -> int:
    return ((x + m - 1) // m) * m


# ---------------------------------------------------------------------------
# Kernels
# ---------------------------------------------------------------------------
def _h2h_fused_kernel(tid_ref, x_ref, wp_ref, bp_ref, wt_ref, bt_ref, o_ref, *,
                      apply_act: bool, apply_out_act: bool):
    """Projector + per-type head (+ optional ReLUs), f32 MXU accumulation."""
    del tid_ref  # only used by the index_maps
    # projector: [TM, in] @ [in, hid] -> [TM, hid]
    h = jnp.dot(x_ref[...], wp_ref[...], preferred_element_type=jnp.float32)
    h = h + bp_ref[...]
    if apply_act:
        h = jnp.maximum(h, 0.0)
    # per-type head: [TM, hid] @ [hid, out_pad] -> [TM, out_pad]
    o = jnp.dot(h.astype(wt_ref.dtype), wt_ref[...],
                preferred_element_type=jnp.float32)
    o = o + bt_ref[...]
    if apply_out_act:
        o = jnp.maximum(o, 0.0)
    o_ref[...] = o.astype(o_ref.dtype)


def _h2h_folded_kernel(tid_ref, x_ref, w_ref, b_ref, o_ref, *,
                       apply_out_act: bool):
    """Single GEMM with pre-folded (projector @ head) weights (activation=None)."""
    del tid_ref
    o = jnp.dot(x_ref[...], w_ref[...], preferred_element_type=jnp.float32)
    o = o + b_ref[...]
    if apply_out_act:
        o = jnp.maximum(o, 0.0)
    o_ref[...] = o.astype(o_ref.dtype)


# ---------------------------------------------------------------------------
# Wrapper
# ---------------------------------------------------------------------------
def homo_to_hetero_linear(feat, params, *, activation=None, output_activation=None,
                          tile_m=512, compute_dtype=None):
    """Pallas implementation of HomoToHeteroLinear.forward.

    Args:
      feat: dict typ -> [N_typ, in_size] array.
      params: dict with:
        'proj_w': [in_size//2, in_size]   (PyTorch Linear weight layout)
        'proj_b': [in_size//2]
        'heads' : dict typ -> {'w': [out_dim, in_size//2], 'b': [out_dim]}
      activation / output_activation: None or "relu".
      tile_m: row tile (16-aligned; large tiles amortize pipeline overhead).
      compute_dtype: dtype for x / weights fed to the MXU (biases + accumulation
        stay f32).  jnp.bfloat16 recommended on v6e/v7x.
    Returns:
      dict typ -> [N_typ, out_dim] array.
    """
    # TODO(synk): arbitrary nn.Module activations are not representable; only
    # None / ReLU are fused in-kernel.
    assert activation in (None, "relu")
    assert output_activation in (None, "relu")

    in_half, in_size = params["proj_w"].shape
    types = list(feat.keys())
    out_dims = {t: params["heads"][t]["w"].shape[0] for t in types}
    num_types = len(types)
    out_pad = _round_up(max(out_dims.values()), 128)      # lane-dense output

    out_dtype = feat[types[0]].dtype
    if compute_dtype is None:
        compute_dtype = out_dtype
    compute_dtype = jnp.dtype(compute_dtype)
    itm = compute_dtype.itemsize
    out_itm = jnp.dtype(out_dtype).itemsize

    # --- row tiling: one shared tile, each type padded to a multiple of it ---
    max_n = max(feat[t].shape[0] for t in types)
    tm = min(int(tile_m), _round_up(max_n, 16))
    tm = _round_up(tm, 16)                                 # sublane / bf16 packing

    # --- one-time weight prep (plain-JAX glue) ------------------------------
    wp = params["proj_w"].T.astype(compute_dtype)          # [in, hid]
    bp = params["proj_b"].reshape(1, in_half).astype(jnp.float32)

    wt_list, bt_list = [], []
    for t in types:
        head = params["heads"][t]
        d = out_dims[t]
        wt_list.append(jnp.pad(head["w"].T.astype(compute_dtype),
                               ((0, 0), (0, out_pad - d))))        # [hid, out_pad]
        bt_list.append(jnp.pad(head["b"].astype(jnp.float32),
                               (0, out_pad - d)).reshape(1, out_pad))
    wt_all = jnp.stack(wt_list, axis=0)                    # [T, hid, out_pad]
    bt_all = jnp.stack(bt_list, axis=0)                    # [T, 1,   out_pad]

    # --- concatenate all types' rows; per-tile type id for scalar prefetch ---
    x_blocks, tids, row_off = [], [], {}
    off = 0
    for ti, t in enumerate(types):
        x = feat[t].astype(compute_dtype)
        n = x.shape[0]
        n_pad = _round_up(n, tm)
        x_blocks.append(jnp.pad(x, ((0, n_pad - n), (0, 0))))
        tids.extend([ti] * (n_pad // tm))
        row_off[t] = off
        off += n_pad
    x_all = jnp.concatenate(x_blocks, axis=0)              # [N_total, in_size]
    tid = jnp.asarray(tids, dtype=jnp.int32)               # [num_tiles]
    n_total = x_all.shape[0]
    grid = (n_total // tm,)

    apply_act = activation == "relu"
    apply_out_act = output_activation == "relu"

    if activation is None:
        # Fold the two linears: out = x @ (Wp^T Wt^T) + (bp Wt^T + bt).
        wp_f32 = params["proj_w"].T.astype(jnp.float32)
        wt_f32 = wt_all.astype(jnp.float32)
        w_fold = jnp.einsum("ih,tho->tio", wp_f32, wt_f32).astype(compute_dtype)
        b_fold = jnp.einsum("xh,tho->txo", bp, wt_f32) + bt_all     # f32

        vmem_need = (2 * tm * in_size * itm                 # x (double-buffered)
                     + 2 * tm * out_pad * out_itm           # out
                     + 2 * (in_size * out_pad * itm + out_pad * 4)  # W_fold, b_fold
                     + 2 * tm * out_pad * 4)                # f32 temporaries
        vmem_limit = int(min(max(2 * vmem_need, 16 << 20), 48 << 20))

        kernel = functools.partial(_h2h_folded_kernel, apply_out_act=apply_out_act)
        out_all = pl.pallas_call(
            kernel,
            out_shape=jax.ShapeDtypeStruct((n_total, out_pad), out_dtype),
            grid_spec=pltpu.PrefetchScalarGridSpec(
                num_scalar_prefetch=1,
                grid=grid,
                in_specs=[
                    pl.BlockSpec((tm, in_size), lambda i, t_ref: (i, 0)),
                    pl.BlockSpec((None, in_size, out_pad),
                                 lambda i, t_ref: (t_ref[i], 0, 0)),
                    pl.BlockSpec((None, 1, out_pad),
                                 lambda i, t_ref: (t_ref[i], 0, 0)),
                ],
                out_specs=pl.BlockSpec((tm, out_pad), lambda i, t_ref: (i, 0)),
            ),
            compiler_params=pltpu.CompilerParams(
                dimension_semantics=("parallel",),
                vmem_limit_bytes=vmem_limit),
        )(tid, x_all, w_fold, b_fold)
    else:
        vmem_need = (2 * tm * in_size * itm                 # x (double-buffered)
                     + 2 * tm * out_pad * out_itm           # out
                     + 2 * (in_size * in_half * itm + in_half * 4)   # Wp, bp
                     + 2 * (in_half * out_pad * itm + out_pad * 4)   # Wt, bt
                     + tm * in_half * 4 + tm * out_pad * 4)          # f32 temporaries
        vmem_limit = int(min(max(2 * vmem_need, 16 << 20), 48 << 20))

        kernel = functools.partial(_h2h_fused_kernel,
                                   apply_act=apply_act,
                                   apply_out_act=apply_out_act)
        out_all = pl.pallas_call(
            kernel,
            out_shape=jax.ShapeDtypeStruct((n_total, out_pad), out_dtype),
            grid_spec=pltpu.PrefetchScalarGridSpec(
                num_scalar_prefetch=1,
                grid=grid,
                in_specs=[
                    pl.BlockSpec((tm, in_size), lambda i, t_ref: (i, 0)),       # x rows
                    pl.BlockSpec((in_size, in_half), lambda i, t_ref: (0, 0)),  # Wp (resident)
                    pl.BlockSpec((1, in_half), lambda i, t_ref: (0, 0)),        # bp
                    pl.BlockSpec((None, in_half, out_pad),                      # Wt[type]
                                 lambda i, t_ref: (t_ref[i], 0, 0)),
                    pl.BlockSpec((None, 1, out_pad),                            # bt[type]
                                 lambda i, t_ref: (t_ref[i], 0, 0)),
                ],
                out_specs=pl.BlockSpec((tm, out_pad), lambda i, t_ref: (i, 0)),
            ),
            compiler_params=pltpu.CompilerParams(
                dimension_semantics=("parallel",),
                vmem_limit_bytes=vmem_limit),
        )(tid, x_all, wp, bp, wt_all, bt_all)

    # slice each type's live rows / live output columns back out
    out_feat = {}
    for t in types:
        o0 = row_off[t]
        n = feat[t].shape[0]
        out_feat[t] = out_all[o0:o0 + n, :out_dims[t]]
    return out_feat


# ---------------------------------------------------------------------------
# Pure-JAX reference (matches the PyTorch forward exactly)
# ---------------------------------------------------------------------------
def _reference(feat, params, *, activation=None, output_activation=None):
    out_feat = {}
    for typ, x in feat.items():
        h = x @ params["proj_w"].T + params["proj_b"]
        if activation == "relu":
            h = jnp.maximum(h, 0.0)
        head = params["heads"][typ]
        o = h @ head["w"].T + head["b"]
        if output_activation == "relu":
            o = jnp.maximum(o, 0.0)
        out_feat[typ] = o
    return out_feat


if __name__ == "__main__":
    key = jax.random.PRNGKey(0)

    in_size = 32
    out_size = {"agent": 16, "object": 48}       # heterogeneous output dims
    n_rows = {"agent": 8, "object": 16}          # per-type batch sizes
    in_half = in_size // 2

    # Deterministic parameter init (PyTorch-Linear-shaped weights).
    kp, kpb, *kheads = jax.random.split(key, 2 + 2 * len(out_size))
    bound_p = 1.0 / (in_size ** 0.5)
    params = {
        "proj_w": jax.random.uniform(kp, (in_half, in_size), jnp.float32,
                                     -bound_p, bound_p),
        "proj_b": jax.random.uniform(kpb, (in_half,), jnp.float32,
                                     -bound_p, bound_p),
        "heads": {},
    }
    bound_h = 1.0 / (in_half ** 0.5)
    for i, (typ, dim) in enumerate(out_size.items()):
        kw, kb = kheads[2 * i], kheads[2 * i + 1]
        params["heads"][typ] = {
            "w": jax.random.uniform(kw, (dim, in_half), jnp.float32,
                                    -bound_h, bound_h),
            "b": jax.random.uniform(kb, (dim,), jnp.float32, -bound_h, bound_h),
        }

    # Deterministic heterogeneous input features.
    kfa, kfo = jax.random.split(jax.random.PRNGKey(1), 2)
    feat = {
        "agent": jax.random.normal(kfa, (n_rows["agent"], in_size), jnp.float32),
        "object": jax.random.normal(kfo, (n_rows["object"], in_size), jnp.float32),
    }

    # 1) activation=ReLU -> fused projector+head kernel, single launch for all types.
    out = homo_to_hetero_linear(feat, params, activation="relu",
                                output_activation=None)
    out = jax.tree_util.tree_map(jax.block_until_ready, out)
    ref = _reference(feat, params, activation="relu", output_activation=None)
    for typ in out_size:
        assert out[typ].shape == (n_rows[typ], out_size[typ])
        assert jnp.allclose(out[typ], ref[typ], atol=1e-5, rtol=1e-5)

    # 2) module defaults (activation=None) -> folded single-GEMM kernel.
    out0 = homo_to_hetero_linear(feat, params, activation=None,
                                 output_activation=None)
    out0 = jax.tree_util.tree_map(jax.block_until_ready, out0)
    ref0 = _reference(feat, params, activation=None, output_activation=None)
    for typ in out_size:
        assert out0[typ].shape == (n_rows[typ], out_size[typ])
        assert jnp.allclose(out0[typ], ref0[typ], atol=1e-4, rtol=1e-4)

    # 3) bf16 compute path (recommended on v6e/v7x) -> loose-tolerance sanity check.
    outb = homo_to_hetero_linear(feat, params, activation="relu",
                                 output_activation=None,
                                 compute_dtype=jnp.bfloat16)
    outb = jax.tree_util.tree_map(jax.block_until_ready, outb)
    for typ in out_size:
        assert jnp.allclose(outb[typ].astype(jnp.float32), ref[typ],
                            atol=1e-1, rtol=1e-1)

    print("KERNEL_OK")
</pallas_src>

<mosaic_0001>
module attributes {stable_mosaic.version = 11 : i64} {
  func.func @_h2h_fused_kernel(%arg0: i32, %arg1: memref<2xi32, #tpu.memory_space<smem>>, %arg2: memref<16x32xf32, #tpu.memory_space<vmem>>, %arg3: memref<32x16xf32, #tpu.memory_space<vmem>>, %arg4: memref<1x16xf32, #tpu.memory_space<vmem>>, %arg5: memref<1x16x128xf32, #tpu.memory_space<vmem>>, %arg6: memref<1x1x128xf32, #tpu.memory_space<vmem>>, %arg7: memref<16x128xf32, #tpu.memory_space<vmem>>) attributes {dimension_semantics = [#tpu.dimension_semantics<parallel>], iteration_bounds = array<i64: 2>, scalar_prefetch = 1 : i64, scratch_operands = 0 : i64, tpu.core_type = #tpu.core_type<tc>, window_params = [{transform_indices = @transform_0, window_bounds = array<i64: 16, 32>}, {pipeline_mode = #tpu.pipeline_mode<synchronous>, transform_indices = @transform_1, window_bounds = array<i64: 32, 16>}, {pipeline_mode = #tpu.pipeline_mode<synchronous>, transform_indices = @transform_2, window_bounds = array<i64: 1, 16>}, {transform_indices = @transform_3, window_bounds = array<i64: 1, 16, 128>}, {transform_indices = @transform_4, window_bounds = array<i64: 1, 1, 128>}, {transform_indices = @transform_5, window_bounds = array<i64: 16, 128>}]} {
    %c0 = arith.constant 0 : index
    %c0_0 = arith.constant 0 : index
    %0 = vector.load %arg2[%c0, %c0_0] : memref<16x32xf32, #tpu.memory_space<vmem>>, vector<16x32xf32>
    %c0_1 = arith.constant 0 : index
    %c0_2 = arith.constant 0 : index
    %1 = vector.load %arg3[%c0_1, %c0_2] : memref<32x16xf32, #tpu.memory_space<vmem>>, vector<32x16xf32>
    %cst = arith.constant dense<0.000000e+00> : vector<16x16xf32>
    %2 = tpu.matmul %0, %1, %cst {dimension_numbers = #tpu.dot_dimension_numbers<[1], [0], [0], [1], [0, 0, 1, 1], [], []>} : vector<16x32xf32>, vector<32x16xf32>, vector<16x16xf32> -> vector<16x16xf32>
    %c0_3 = arith.constant 0 : index
    %c0_4 = arith.constant 0 : index
    %3 = vector.load %arg4[%c0_3, %c0_4] : memref<1x16xf32, #tpu.memory_space<vmem>>, vector<1x16xf32>
    %4 = vector.broadcast %3 : vector<1x16xf32> to vector<16x16xf32>
    %5 = arith.addf %2, %4 : vector<16x16xf32>
    %cst_5 = arith.constant 0.000000e+00 : f32
    %6 = vector.broadcast %cst_5 : f32 to vector<16x16xf32>
    %7 = arith.maximumf %5, %6 : vector<16x16xf32>
    %c0_6 = arith.constant 0 : index
    %c0_7 = arith.constant 0 : index
    %c0_8 = arith.constant 0 : index
    %8 = vector.load %arg5[%c0_6, %c0_7, %c0_8] : memref<1x16x128xf32, #tpu.memory_space<vmem>>, vector<1x16x128xf32>
    %9 = vector.shape_cast %8 : vector<1x16x128xf32> to vector<16x128xf32>
    %cst_9 = arith.constant dense<0.000000e+00> : vector<16x128xf32>
    %10 = tpu.matmul %7, %9, %cst_9 {dimension_numbers = #tpu.dot_dimension_numbers<[1], [0], [0], [1], [0, 0, 1, 1], [], []>} : vector<16x16xf32>, vector<16x128xf32>, vector<16x128xf32> -> vector<16x128xf32>
    %c0_10 = arith.constant 0 : index
    %c0_11 = arith.constant 0 : index
    %c0_12 = arith.constant 0 : index
    %11 = vector.load %arg6[%c0_10, %c0_11, %c0_12] : memref<1x1x128xf32, #tpu.memory_space<vmem>>, vector<1x1x128xf32>
    %12 = vector.shape_cast %11 : vector<1x1x128xf32> to vector<1x128xf32>
    %13 = vector.broadcast %12 : vector<1x128xf32> to vector<16x128xf32>
    %14 = arith.addf %10, %13 : vector<16x128xf32>
    %c0_13 = arith.constant 0 : index
    %c0_14 = arith.constant 0 : index
    %15 = vector.load %arg7[%c0_13, %c0_14] : memref<16x128xf32, #tpu.memory_space<vmem>>, vector<16x128xf32>
    tpu.vector_store %arg7[%c0_13, %c0_14], %14 {strides = array<i32>} : memref<16x128xf32, #tpu.memory_space<vmem>>, vector<16x128xf32>,
    return
  }
  func.func @transform_0(%arg0: i32, %arg1: memref<2xi32, #tpu.memory_space<smem>>) -> (i32, i32) {
    %c0_i32 = arith.constant 0 : i32
    %c0_i32_0 = arith.constant 0 : i32
    return %arg0, %c0_i32 : i32, i32
  }
  func.func @transform_1(%arg0: i32, %arg1: memref<2xi32, #tpu.memory_space<smem>>) -> (i32, i32) {
    %c0_i32 = arith.constant 0 : i32
    %c0_i32_0 = arith.constant 0 : i32
    %c0_i32_1 = arith.constant 0 : i32
    return %c0_i32, %c0_i32_0 : i32, i32
  }
  func.func @transform_2(%arg0: i32, %arg1: memref<2xi32, #tpu.memory_space<smem>>) -> (i32, i32) {
    %c0_i32 = arith.constant 0 : i32
    %c0_i32_0 = arith.constant 0 : i32
    %c0_i32_1 = arith.constant 0 : i32
    return %c0_i32, %c0_i32_0 : i32, i32
  }
  func.func @transform_3(%arg0: i32, %arg1: memref<2xi32, #tpu.memory_space<smem>>) -> (i32, i32, i32) {
    %0 = arith.index_cast %arg0 : i32 to index
    %1 = memref.load %arg1[%0] : memref<2xi32, #tpu.memory_space<smem>>
    %c0_i32 = arith.constant 0 : i32
    %c0_i32_0 = arith.constant 0 : i32
    %c0_i32_1 = arith.constant 0 : i32
    return %1, %c0_i32, %c0_i32_0 : i32, i32, i32
  }
  func.func @transform_4(%arg0: i32, %arg1: memref<2xi32, #tpu.memory_space<smem>>) -> (i32, i32, i32) {
    %0 = arith.index_cast %arg0 : i32 to index
    %1 = memref.load %arg1[%0] : memref<2xi32, #tpu.memory_space<smem>>
    %c0_i32 = arith.constant 0 : i32
    %c0_i32_0 = arith.constant 0 : i32
    %c0_i32_1 = arith.constant 0 : i32
    return %1, %c0_i32, %c0_i32_0 : i32, i32, i32
  }
  func.func @transform_5(%arg0: i32, %arg1: memref<2xi32, #tpu.memory_space<smem>>) -> (i32, i32) {
    %c0_i32 = arith.constant 0 : i32
    %c0_i32_0 = arith.constant 0 : i32
    return %arg0, %c0_i32 : i32, i32
  }
}

</mosaic_0001>

<bundles_post_ra>
// kernel: tpu_custom_call.1
= control target key start
LH: loop header
LB: loop body
LE: loop exit
PB: predicated region body
PF: predicated region fallthrough
CT: control target
= control target key end

     0   :  { %s1143_s0 = inlined_call_operand.vmem [shape: s32[2], index: 0, kind: input, shape index: {}]   ;;  %s1144_s1 = inlined_call_operand.vmem [shape: f32[32,32], index: 1, kind: input, shape index: {}]   ;;  %s1145_s2 = inlined_call_operand.vmem [shape: f32[32,16], index: 2, kind: input, shape index: {}]   ;;  %s1146_s3 = inlined_call_operand.vmem [shape: f32[1,16], index: 3, kind: input, shape index: {}]   ;;  %s1147_s4 = inlined_call_operand.hbm [shape: f32[2,16,128], index: 4, kind: input, shape index: {}]   ;;  %s1148_s5 = inlined_call_operand.vmem [shape: f32[2,1,128], index: 5, kind: input, shape index: {}]   ;;  %s1149_s6 = inlined_call_operand.hbm [shape: f32[32,128], index: 6, kind: output, shape index: {}]  }
   0x1   :  { %s11_s23 = sshll.u32 %s1143_s0, 4  ;;  %s12_s23 = int_to_ptr.vmem [resolvable:$true] %s11_s23 }
   0x2   :  { %s739_s24 = scalar_lea.vmem %s12_s23, 16  ;;  %p744_p1 = scmp.lt.s32.totalorder %s12_s23, %s12_s23 }
   0x3   :  { %p740_p0 = scmp.ne.s32.totalorder %s12_s23, %s739_s24  ;;  %p745_p2 = scmp.lt.s32.totalorder %s739_s24, %s739_s24 }
   0x5   :  { %p746_p3 = por %p745_p2, %p744_p1 }
   0x7   :  { %p747_p4 = pnand %p746_p3, %p740_p0 }
   0x9   :  { %750 = shalt.err (!%p747_p4)  }
   0xa   :  { %s875_s25 = smov [#allocation3]  }
   0xb   :  { %14 = dma.vmem_to_smem %s12_s23, 16, %s875_s25, [#allocation2] }
   0xc   :  { %837 = dma.done.wait [#allocation2], 16 }
   0xd   :  { %838 = vsyncadd [#allocation2], 4294967280 }
   0xe   :  { %16 = sfence }
   0xf   :  { %17 = vsyncpa [#allocation5], 0 }
  0x10   :  { %19 = vsyncpa [#allocation5 + $0x1], 0 }
  0x11   :  { %20 = vsyncpa [#allocation6], 0 }
  0x12   :  { %22 = vsyncpa [#allocation6 + $0x1], 0  ;;  %s920_s26 = smov 0   ;;  %s922_s0 = smov 0  }
  0x13   :  { %s924_s27 = smov 0   ;;  %s926_s28 = smov 0  }
  0x14   :  { %s928_s29 = smov 0   ;;  %s930_s30 = smov 0  }
  0x15   :  { %s932_s7 = smov 0  }
  0x16 LB: > { %s954_s8 = sadd.s32 4294967295, %s873_s7   ;;  %s596_s9 = sadd.s32 4294967294, %s873_s7   ;;  %s873_s7 = sphi %s932_s7, %s1170_s7   ;;  %s869_s30 = sphi %s930_s30, %s1169_s30   ;;  %s865_s29 = sphi %s928_s29, %s1168_s29   ;;  %s861_s28 = sphi %s926_s28, %s1167_s28   ;;  %s857_s27 = sphi %s924_s27, %s1166_s27   ;;  %s853_s0 = sphi %s922_s0, %s1165_s0   ;;  %s849_s26 = sphi %s920_s26, %s1164_s26  }
  0x17   : > { %s958_s10 = sadd.s32 1, %s873_s7   ;;  %s100_s11 = sld [smem:[#allocation3 + %s873_s7]] }
  0x18   : > { %s101_s12 = sld [smem:[#allocation3 + %s958_s10]]  ;;  %s105_s13 = sadd.s32 1, %s869_s30 }
  0x19   : > { %p112_p5 = scmp.ne.s32.totalorder %s869_s30, %s865_s29  ;;  %p113_p6 = scmp.eq.s32.totalorder %s873_s7, 0 }
  0x1a   : > { %p118_p7 = scmp.ne.s32.totalorder %s865_s29, %s861_s28  ;;  %p119_p8 = scmp.eq.s32.totalorder %s954_s8, 0 }
  0x1b   : > { %p968_p9 = por %p113_p6, %p112_p5  ;;  %s156_s15 = ssub.s32 %s873_s7, %s958_s10 }
  0x1c   : > { %p974_p10 = por %p119_p8, %p118_p7  ;;  %p157_p11 = scmp.eq.s32.totalorder %s156_s15, 0 }
  0x1d   : > { %s159_s17 = sadd.s32 1, %s857_s27  ;;  %p169_p12 = scmp.ne.s32.totalorder %s857_s27, %s853_s0 }
  0x1e   : > { %s1153_s16 = scalar_select %p974_p10, 1, 0 }
  0x1f   : > { %s102_s18 = ssub.s32 %s100_s11, %s101_s12  ;;  %p170_p13 = scmp.eq.s32.totalorder %s954_s8, 1 }
  0x20   : > { %p103_p0 = scmp.eq.s32.totalorder %s102_s18, 0  ;;  %p175_p1 = scmp.ne.s32.totalorder %s853_s0, %s849_s26 }
  0x21   : > { %s985_s19 = scalar_select %p157_p11, %s857_s27, %s159_s17  }
  0x22   : > { %s988_s20 = scalar_select %p103_p0, %s869_s30, %s105_s13  }
  0x23   : > { %p990_p2 = por %p170_p13, %p169_p12  ;;  %p176_p3 = scmp.eq.s32.totalorder %s596_s9, 1 }
  0x24   : > { %1154 = sst [smem:[#allocation13_spill]] %s988_s20  ;;  %p676_p5 = scmp.lt.s32.totalorder %s873_s7, 2 }
  0x25   : > { %s1155_s21 = scalar_select %p990_p2, 1, 0 }
  0x26   : > { %p996_p6 = por %p176_p3, %p175_p1  ;;  %s211_s23 = sand.u32 1, %s869_s30  }
  0x27   : > { %s599_s24 = sshll.u32 %s211_s23, 4  ;;  %p1003_p7 = pnand %p676_p5, %p968_p9 }
  0x28   : > { %s1156_s22 = scalar_select %p996_p6, 1, 0 }
  0x29   : > { %s660_s28 = scalar_select %p968_p9, [#allocation3], [#allocation8] }
  0x2a   : > { %s661_s11 = scalar_select %p968_p9, %s873_s7, 0 }
  0x2b   : > { %s1172_s28 = smov (!%p676_p5, %s660_s28), [#allocation9]  ;;  %s215_s12 = scalar_lea.vmem [#allocation4], %s599_s24 }
  0x2c   : > { %s1174_s11 = smov (!%p676_p5, %s661_s11), 0  ;;  %s223_s13 = sshll.u32 %s215_s12, 4  ;;  %s1014_s13 = int_to_ptr.vmem [resolvable:$true] %s223_s13 }
  0x2d   : > { %s216_s9 = sld [smem:[%s1172_s28 + %s1174_s11]]  ;;  %p602_p8 = scmp.ge.s32.totalorder %s873_s7, 1 }
  0x2e   : > { %p239_p11 = scmp.lt.s32.totalorder %s873_s7, 3  ;;  %s1025_s24 = scalar_lea.sflag [#allocation5], %s211_s23 }
  0x2f   : > { %p753_p13 = pneg %p1003_p7  ;;  %s756_s20 = scalar_lea.hbm %s1147_s4, 512 }
  0x30   : > { %p1016_p12 = pnand %p602_p8, %p239_p11 }
  0x33   : > { %s618_s17 = sshll.u32 %s216_s9, 8 }
  0x34   : > { %s1023_s14 = scalar_lea.hbm %s1147_s4, %s618_s17 }
  0x35   : > { %s751_s28 = scalar_lea.hbm %s1023_s14, 256  ;;  %p757_p3 = scmp.lt.u32.totalorder %s1023_s14, %s1147_s4 }
  0x36   : > { %p752_p9 = scmp.ne.s32.totalorder %s1023_s14, %s751_s28  ;;  %p758_p5 = scmp.lt.u32.totalorder %s756_s20, %s751_s28 }
  0x37   : > { %p760_p11 = scmp.lt.u32.totalorder %s751_s28, %s1023_s14 }
  0x38   : > { %p754_p0 = pnand %p753_p13, %p752_p9  ;;  %p759_p8 = por %p758_p5, %p757_p3 }
  0x3a   : > { %p755_p1 = pneg %p754_p0  ;;  %p761_p4 = por %p760_p11, %p759_p8 }
  0x3c   : > { %p762_p6 = pnand %p761_p4, %p755_p1 }
  0x3e   : > { %765 = shalt.err (!%p762_p6)
}
  0x3f   : > { %s766_s23 = scalar_lea.vmem %s1014_s13, 256  ;;  %s876_s18 = smov [#allocation4]  }
  0x40   : > { %p767_p9 = scmp.ne.s32.totalorder %s1014_s13, %s766_s23  ;;  %s771_s11 = sshll.u32 %s876_s18, 4  ;;  %s772_s11 = int_to_ptr.vmem [resolvable:$false] %s771_s11 }
  0x41   : > { %s773_s9 = scalar_lea.vmem %s772_s11, 512  ;;  %p774_p10 = scmp.lt.s32.totalorder %s1014_s13, %s772_s11 }
  0x42   : > { %p769_p0 = pnand %p767_p9, %p753_p13  ;;  %p775_p3 = scmp.lt.s32.totalorder %s773_s9, %s766_s23 }
  0x44   : > { %p770_p2 = pneg %p769_p0  ;;  %p776_p5 = por %p775_p3, %p774_p10 }
  0x46   : > { %p777_p8 = pnand %p776_p5, %p770_p2 }
  0x48   : > { %780 = shalt.err (!%p777_p8)
}
  0x49   : > { %s877_s28 = smov 128   ;;  %s878_s20 = smov 8  }
  0x4a   : > { %671 = dma.hbm_to_vmem [thread:$0]  (!%p1003_p7), %s1023_s14, 256, %s1014_s13, %s1025_s24, %s877_s28, %s877_s28, %s878_s20  }
  0x4b   : > { %243 = sbr.rel (%p1016_p12) target bundleno = 542 (0x21e), region = 40  ;;  %s245_s12 = sand.u32 (!%p1016_p12), 1, %s865_s29  }
  0x4c   : > { %s603_s17 = sshll.u32 (!%p1016_p12), %s245_s12, 4  ;;  %s246_s18 = scalar_lea.sflag (!%p1016_p12), [#allocation5], %s245_s12 }
  0x4d   : > { %s249_s23 = scalar_lea.vmem (!%p1016_p12), [#allocation4], %s603_s17  ;;  %p1159_p10 = scmp.ne.s32.totalorder (!%p1016_p12), %s1153_s16, 0 }
  0x52   : > { %840 = dma.done.wait (%p1159_p10), %s246_s18, 256  }
  0x53   : > { %842 = vsyncadd (%p1159_p10), %s246_s18, 4294967040  ;;  %s605_s11 = sshll.u32 %s954_s8, 1  ;;  %vm311_vm0 = vcmask 261120   ;;  %v300_v0 = vld [vmem:[%s1145_s2] sm:$0xff]  ;;  %v301_v1 = vld [vmem:[%s1145_s2 + $0x8] sm:$0xff]  ;;  %vm404_vm1 = vcmask 130048  }
  0x54   : > { %p286_p2 = scmp.lt.s32.totalorder %s605_s11, 3  ;;  %v302_v2 = vld [vmem:[%s1145_s2 + $0x10] sm:$0xff]  ;;  %v648_v3 = vpack.c.bf16 %v301_v1, %v300_v0  ;;  %v303_v4 = vld [vmem:[%s1145_s2 + $0x18] sm:$0xff]  ;;  %v607_v11 = vld [vmem:[%s1146_s3] ss:$0 sm:$0xff]  ;;  %s292_s13 = sld [smem:[#allocation3 + %s954_s8]] }
  0x55   : > { %v652_v6 = vpack.c.bf16 %v303_v4, %v302_v2  ;;  %v395_v8 = vld [vmem:[%s249_s23] sm:$0xff]  ;;  %v396_v9 = vld [vmem:[%s249_s23 + $0x8] sm:$0xff]  ;;  %s282_s23 = sand.u32 1, %s853_s0   ;;  %s619_s16 = sshll.u32 %s954_s8, 8 }
  0x56   : > { %s1176_s11 = smov (!%p286_p2, %s605_s11), 3  ;;  %649 = vmatprep.subr.bf16.mxu0 %v648_v3  ;;  %v656_v10 = vpack.c.bf16 %v396_v9, %v395_v8  ;;  %s604_s14 = sshll.u32 %s282_s23, 4 }
  0x57   : > { %s606_s25 = sshll.u32 %s1176_s11, 3  ;;  %651 = vmatpush3.bf16.msra.mxu0 %v648_v3  ;;  %s284_s28 = scalar_lea.vmem [#allocation7], %s604_s14 }
  0x58   : > { %s289_s15 = scalar_lea.vmem %s1144_s1, %s606_s25  ;;  %653 = vmatprep.subr.bf16.mxu0 %v652_v6  ;;  %657 = vmatprep.subr.bf16.mxu1 %v656_v10  ;;  %s502_s20 = sshll.u32 %s284_s28, 4  ;;  %s1085_s20 = int_to_ptr.vmem [resolvable:$true] %s502_s20 }
  0x59   : > { %v298_v5 = vld [vmem:[%s289_s15] sm:$0xff]  ;;  %v299_v7 = vld [vmem:[%s289_s15 + $0x8] sm:$0xff]  ;;  %659 = vmatpush3.bf16.msra.mxu1 %v656_v10  ;;  %s1090_s18 = scalar_lea.hbm %s1149_s6, %s619_s16  ;;  %s1092_s11 = scalar_lea.sflag [#allocation6], %s282_s23 }
  0x5a   : > { %638 = vmatprep.mubr.msk.f32.mxu0 %vm311_vm0, %v298_v5  ;;  %p293_p4 = scmp.lt.s32.totalorder %s292_s13, 1  ;;  %s781_s25 = scalar_lea.vmem %s1085_s20, 256 }
  0x5b   : > { %655 = vmatpush3.bf16.msra.mxu0 %v652_v6  ;;  %p782_p6 = scmp.ne.s32.totalorder %s1085_s20, %s781_s25  ;;  %p1160_p7 = scmp.ne.s32.totalorder %s1155_s21, 0 }
  0x5c   : > { %s1178_s13 = smov (!%p293_p4, %s292_s13), 1  ;;  %s879_s8 = smov [#allocation7]  }
  0x5d   : > { %s295_s9 = scalar_lea.vmem %s1148_s5, %s1178_s13  ;;  %p783_p12 = pnand %p782_p6, %p1160_p7 }
  0x5e   : > { %639 = vmatmul.mubr.msk.f32.vlgmr.msra.gmra.mrb[0].mxu0 %vm311_vm0, %v299_v7  ;;  %v610_v18 = vld [vmem:[%s295_s9] ss:$0 sm:$0xff]  ;;  %s785_s13 = sshll.u32 %s879_s8, 4  ;;  %s786_s13 = int_to_ptr.vmem [resolvable:$false] %s785_s13 }
  0x5f   : > { %p784_p13 = pneg %p783_p12  ;;  %s787_s14 = scalar_lea.vmem %s786_s13, 512 }
  0x60   : > { %p788_p1 = scmp.lt.s32.totalorder %s1085_s20, %s786_s13  ;;  %p789_p11 = scmp.lt.s32.totalorder %s787_s14, %s781_s25 }
  0x62   : > { %p790_p9 = por %p789_p11, %p788_p1 }
  0x64   : > { %p791_p0 = pnand %p790_p9, %p784_p13 }
 0x131   : > { %v640_v12 = vpop.f32.mrb[0].mxu0 }
 0x132   : > { %v390_v13 = vadd.f32 %v640_v12, %v607_v11  ;;  %v384_v14 = vpop.f32.mrb[1].mxu0 }
 0x133   : > { %v385_v15 = vadd.f32 %v607_v11, %v384_v14 }
 0x134   : > { %v394_v17 = vmax.f32 %v390_v13, 0.0 }
 0x135   : > { %v393_v16 = vmax.f32 %v385_v15, 0.0 }
 0x137   : > { %645 = vmatprep.mubr.msk.f32.mxu1 %vm404_vm1, %v393_v16 }
 0x138   : > { %646 = vmatmul.mubr.msk.f32.vlgmr.msra.gmra.mrb[0].mxu1 %vm404_vm1, %v394_v17 }
 0x20b   : > { %v647_v19 = vpop.f32.mrb[0].mxu1 }
 0x20c   : > { %v483_v20 = vadd.f32 %v647_v19, %v610_v18  ;;  %v477_v21 = vpop.f32.mrb[1].mxu1 }
 0x20d   : > { %v478_v22 = vadd.f32 %v610_v18, %v477_v21 }
 0x20e   : > { %487 = vst [vmem:[%s284_s28 + $0x8] sm:$0xff] %v483_v20 }
 0x20f   : > { %486 = vst [vmem:[%s284_s28] sm:$0xff] %v478_v22 }
 0x210   : > { %794 = shalt.err (!%p791_p0)
}
 0x211   : > { %s795_s23 = scalar_lea.hbm %s1090_s18, 256  ;;  %s799_s9 = scalar_lea.hbm %s1149_s6, 512 }
 0x212   : > { %p796_p3 = scmp.ne.s32.totalorder %s1090_s18, %s795_s23  ;;  %p800_p10 = scmp.lt.u32.totalorder %s1090_s18, %s1149_s6 }
 0x213   : > { %p801_p2 = scmp.lt.u32.totalorder %s799_s9, %s795_s23  ;;  %p803_p6 = scmp.lt.u32.totalorder %s795_s23, %s1090_s18 }
 0x214   : > { %p797_p5 = pnand %p796_p3, %p1160_p7 }
 0x215   : > { %p802_p4 = por %p801_p2, %p800_p10 }
 0x216   : > { %p798_p8 = pneg %p797_p5 }
 0x217   : > { %p804_p12 = por %p803_p6, %p802_p4 }
 0x219   : > { %p805_p13 = pnand %p804_p12, %p798_p8 }
 0x21b   : > { %808 = shalt.err (!%p805_p13)
}
 0x21c   : > { %s880_s12 = smov 128   ;;  %s881_s17 = smov 8  }
 0x21d   : > { %664 = dma.vmem_to_hbm [thread:$0]  (%p1160_p7), %s1085_s20, 256, %s1090_s18, %s1092_s11, %s880_s12, %s880_s12, %s881_s17  }
 0x21e PF: > { %s517_s25 = sand.u32 1, %s849_s26   ;;  %p1161_p1 = scmp.ne.s32.totalorder %s1156_s22, 0 }
 0x21f   : > { %p1162_p11 = scmp.ge.s32.totalorder %s873_s7, 2  ;;  %s518_s8 = scalar_lea.sflag [#allocation6], %s517_s25 }
 0x221   : > { %p673_p9 = pnand %p1162_p11, %p1161_p1 }
 0x223   : > { %844 = dma.done.wait (!%p673_p9), %s518_s8, 256  }
 0x224   : > { %846 = vsyncadd (!%p673_p9), %s518_s8, 4294967040  ;;  %s1163_s13 = sld [smem:[#allocation13_spill]]  ;;  %p25_p7 = scmp.ge.s32.totalorder %s958_s10, 4  }
 0x225   : > { %s1164_s26 = smov %s853_s0  ;;  %s1165_s0 = smov %s857_s27 }
 0x226   : > { %s1166_s27 = smov %s985_s19  ;;  %s1167_s28 = smov %s865_s29 }
 0x227   : > { %s1168_s29 = smov %s869_s30  ;;  %s1170_s7 = smov %s958_s10 }
 0x228   :  { %27 = sbr.rel (!%p25_p7) target bundleno = 22 (0x16), region = 91 }
 0x22a   : > { %s1169_s30 = smov %s1163_s13 }
 0x22f   :  { %523 = vsyncpa [#allocation5], 1 }
 0x230   :  { %525 = vsyncpa [#allocation5 + $0x1], 1 }
 0x231   :  { %526 = vsyncpa [#allocation6], 1 }
 0x232   :  { %528 = vsyncpa [#allocation6 + $0x1], 1 }

</bundles_post_ra>
